<compile_context>
chip_gen: v7x
topology: tpu7x:2x2x1
jax: 0.10.0
libtpu: 0.0.40
codegen_flags: <defaults>
</compile_context>

<pallas_src>
import jax
import jax.numpy as jnp
from jax.experimental import pallas as pl
from jax.experimental.pallas import tpu as pltpu

EPS = 1e-5


def _round_up(x, m):
    return ((x + m - 1) // m) * m


def _cdiv(a, b):
    return -(-a // b)


def _vmem_limit_bytes():
    """Scoped-VMEM limit: ~3/4 of physical VMEM, capped at 100 MiB."""
    try:
        cap = pltpu.get_tpu_info().vmem_capacity_bytes
    except Exception:
        cap = 64 * 1024 * 1024            # worst case (v7x per-TC VMEM)
    return int(min(cap * 3 // 4, 100 * 1024 * 1024))


def _pick_tile_hw(hw, c, c_mid_p, vmem_limit):
    """Pixel-tile size: multiple of 128, double-buffering-aware budget,
    cdiv-balanced across tiles so padding waste stays small."""
    budget = max(vmem_limit // 2, 4 * 1024 * 1024)
    # live f32 bytes per pixel per grid step (pass 2 is the heavier pass):
    #   x in x2 (double-buffered) + out x2 (double-buffered)
    #   + a / gate temporaries (~2*C) + g/h temporaries (~2*c_mid_p)
    per_pixel = 4 * (2 * c + 2 * c + 2 * c + 2 * c_mid_p)
    t_max = max(budget // max(per_pixel, 1), 128)
    t_max = (t_max // 128) * 128
    hw_pad128 = _round_up(hw, 128)
    if t_max >= hw_pad128:
        return hw_pad128
    n_tiles = _cdiv(hw, t_max)
    return _round_up(_cdiv(hw, n_tiles), 128)


# ---------------- pass 1: batch-norm statistics (VMEM accumulator) ---------------- #

def _bn_stats_kernel(x_ref, w1_ref, sum_ref, sumsq_ref, sum_acc, sq_acc):
    j = pl.program_id(1)

    @pl.when(j == 0)
    def _():
        sum_acc[...] = jnp.zeros_like(sum_acc)
        sq_acc[...] = jnp.zeros_like(sq_acc)

    # x_ref: (C, T) pixels-on-lanes, w1_ref: (c_mid_p, C)
    g = jnp.dot(w1_ref[...], x_ref[...],
                preferred_element_type=jnp.float32)            # (c_mid_p, T)
    # Zero-padded pixels contribute exactly 0 to both sums -> no masking.
    # conv-1 bias is constant per channel and cancels in training-mode BN.
    sum_acc[...] += jnp.sum(g, axis=1, keepdims=True)
    sq_acc[...] += jnp.sum(g * g, axis=1, keepdims=True)

    @pl.when(j == pl.num_programs(1) - 1)
    def _():
        sum_ref[...] = sum_acc[...]
        sumsq_ref[...] = sq_acc[...]


# ---------------- pass 2: normalize + ReLU + conv2 + sigmoid gate ---------------- #

def _attention_gate_kernel(x_ref, w1s_ref, shift_ref, w2_ref, b2_ref, o_ref):
    x = x_ref[...]                                              # (C, T)
    # BN scale already folded into w1s -> only a per-row shift remains.
    g = jnp.dot(w1s_ref[...], x, preferred_element_type=jnp.float32)   # (c_mid_p, T)
    h = jnp.maximum(g + shift_ref[...], 0.0)
    a = jnp.dot(w2_ref[...], h, preferred_element_type=jnp.float32)
    a = a + b2_ref[...]                                         # (C, T)
    # sigmoid(a) = 1 / (1 + exp(-a)): exp on EUP, approx reciprocal on EUP,
    # one Newton step on the VPU to restore full precision (free: HBM-bound).
    d = 1.0 + jnp.exp(-a)
    r = pl.reciprocal(d, approx=True)
    r = r * (2.0 - d * r)
    o_ref[...] = (x * r).astype(o_ref.dtype)


def attention_block(x_nchw, params, *, tile_hw=None):
    """x_nchw: (N, C, H, W) float32. Returns (N, C, H, W)."""
    w1, b1, gamma, beta, w2, b2 = params
    del b1  # absorbed by training-mode BatchNorm (cancels in the shift)
    N, C, H, W = x_nchw.shape
    HW = H * W
    c_mid = w1.shape[0]
    c_mid_p = _round_up(c_mid, 8)          # full sublane tiles for g/h

    vmem_limit = _vmem_limit_bytes()
    if tile_hw is None:
        tile_hw = _pick_tile_hw(HW, C, c_mid_p, vmem_limit)
    n_tiles = _cdiv(HW, tile_hw)
    hw_pad = n_tiles * tile_hw

    x3 = x_nchw.reshape(N, C, HW).astype(jnp.float32)
    if hw_pad != HW:
        x3 = jnp.pad(x3, ((0, 0), (0, 0), (0, hw_pad - HW)))

    # Zero-pad c_mid rows/cols up to 8 sublanes (exact: padded rows are zero).
    pad_m = c_mid_p - c_mid
    w1_p = jnp.pad(w1, ((0, pad_m), (0, 0)))
    gamma_p = jnp.pad(gamma, ((0, pad_m), (0, 0)))
    beta_p = jnp.pad(beta, ((0, pad_m), (0, 0)))
    w2_p = jnp.pad(w2, ((0, 0), (0, pad_m)))

    grid = (N, n_tiles)
    x_spec = pl.BlockSpec((None, C, tile_hw), lambda n, j: (n, 0, j))
    w1_spec = pl.BlockSpec((c_mid_p, C), lambda n, j: (0, 0))
    vec_mid = pl.BlockSpec((c_mid_p, 1), lambda n, j: (0, 0))
    w2_spec = pl.BlockSpec((C, c_mid_p), lambda n, j: (0, 0))
    vec_out = pl.BlockSpec((C, 1), lambda n, j: (0, 0))
    stats_spec = pl.BlockSpec((None, c_mid_p, 1), lambda n, j: (n, 0, 0))

    # ---- pass 1: sum / sum-of-squares of g = W1 @ x (accumulated in VMEM) ----
    g_sum_n, g_sumsq_n = pl.pallas_call(
        _bn_stats_kernel,
        out_shape=(jax.ShapeDtypeStruct((N, c_mid_p, 1), jnp.float32),
                   jax.ShapeDtypeStruct((N, c_mid_p, 1), jnp.float32)),
        grid=grid,
        in_specs=[x_spec, w1_spec],
        out_specs=(stats_spec, stats_spec),
        scratch_shapes=[pltpu.VMEM((c_mid_p, 1), jnp.float32),
                        pltpu.VMEM((c_mid_p, 1), jnp.float32)],
        compiler_params=pltpu.CompilerParams(
            dimension_semantics=("parallel", "arbitrary"),
            vmem_limit_bytes=vmem_limit),
    )(x3, w1_p)

    # ---- tiny global reduction + fused BN affine (plain JAX; O(c_mid) work) ----
    n_pix = N * HW
    g_sum = jnp.sum(g_sum_n, axis=0)                   # (c_mid_p, 1)
    g_sumsq = jnp.sum(g_sumsq_n, axis=0)               # (c_mid_p, 1)
    g_mean = g_sum / n_pix
    g_var = jnp.maximum(g_sumsq / n_pix - g_mean * g_mean, 0.0)
    inv_std = jax.lax.rsqrt(g_var + EPS)
    scale = gamma_p * inv_std                          # gamma / sqrt(var + eps)
    shift = beta_p - scale * g_mean                    # conv-1 bias cancels exactly
    w1_eff = scale * w1_p                              # fold BN scale into W1

    # ---- pass 2: normalize, ReLU, conv-2, sigmoid, gate ----
    out3 = pl.pallas_call(
        _attention_gate_kernel,
        out_shape=jax.ShapeDtypeStruct((N, C, hw_pad), jnp.float32),
        grid=grid,
        in_specs=[x_spec, w1_spec, vec_mid, w2_spec, vec_out],
        out_specs=x_spec,
        compiler_params=pltpu.CompilerParams(
            dimension_semantics=("parallel", "parallel"),
            vmem_limit_bytes=vmem_limit),
    )(x3, w1_eff, shift, w2_p, b2)

    if hw_pad != HW:
        out3 = out3[:, :, :HW]
    return out3.reshape(N, C, H, W)


def init_params(key, channels):
    """Parameters in PyTorch layout: conv weights (out, in), column biases."""
    c_mid = max(channels // 8, 1)
    k1, k2, k3, k4 = jax.random.split(key, 4)
    # Conv2d(C, C//8, 1): weight (C//8, C, 1, 1) -> (C//8, C)
    w1 = jax.random.normal(k1, (c_mid, channels), jnp.float32) * 0.1
    b1 = jax.random.normal(k2, (c_mid, 1), jnp.float32) * 0.1
    # BatchNorm2d(C//8): affine params (default init gamma=1, beta=0)
    gamma = jnp.ones((c_mid, 1), jnp.float32)
    beta = jnp.zeros((c_mid, 1), jnp.float32)
    # Conv2d(C//8, C, 1): weight (C, C//8, 1, 1) -> (C, C//8)
    w2 = jax.random.normal(k3, (channels, c_mid), jnp.float32) * 0.1
    b2 = jax.random.normal(k4, (channels, 1), jnp.float32) * 0.1
    return (w1, b1, gamma, beta, w2, b2)


def reference(x_nchw, params):
    """Plain-JAX reference (applies b1 explicitly; the kernel absorbs it)."""
    w1, b1, gamma, beta, w2, b2 = params
    N, C, H, W = x_nchw.shape
    x3 = x_nchw.reshape(N, C, H * W).astype(jnp.float32)
    h = jnp.einsum('mc,nch->nmh', w1, x3) + b1[None]          # (N, Cmid, HW)
    mean = jnp.mean(h, axis=(0, 2), keepdims=True)
    var = jnp.mean((h - mean) ** 2, axis=(0, 2), keepdims=True)
    h = (h - mean) / jnp.sqrt(var + EPS) * gamma[None] + beta[None]
    h = jnp.maximum(h, 0.0)
    a = jnp.einsum('cm,nmh->nch', w2, h) + b2[None]           # (N, C, HW)
    out = x3 * jax.nn.sigmoid(a)
    return out.reshape(N, C, H, W)


if __name__ == "__main__":
    N, C, H, W = 2, 16, 16, 16          # channels >= 8 so that C // 8 >= 1
    key = jax.random.PRNGKey(0)
    kx, kp = jax.random.split(key)
    x = jax.random.normal(kx, (N, C, H, W), jnp.float32)
    params = init_params(kp, C)

    out = attention_block(x, params)
    out = jax.block_until_ready(out)

    ref = reference(x, params)
    assert out.shape == (N, C, H, W)
    max_err = float(jnp.max(jnp.abs(out - ref)))
    assert jnp.allclose(out, ref, atol=1e-4, rtol=1e-4), (
        f"mismatch vs reference (max abs err {max_err})")

    print("KERNEL_OK")
</pallas_src>

<mosaic_0001>
module attributes {stable_mosaic.version = 11 : i64} {
  func.func @_bn_stats_kernel(%arg0: i32, %arg1: i32, %arg2: memref<1x16x256xf32, #tpu.memory_space<vmem>>, %arg3: memref<8x16xf32, #tpu.memory_space<vmem>>, %arg4: memref<1x8x1xf32, #tpu.memory_space<vmem>>, %arg5: memref<1x8x1xf32, #tpu.memory_space<vmem>>, %arg6: memref<8x1xf32, #tpu.memory_space<vmem>>, %arg7: memref<8x1xf32, #tpu.memory_space<vmem>>) attributes {dimension_semantics = [#tpu.dimension_semantics<parallel>, #tpu.dimension_semantics<arbitrary>], iteration_bounds = array<i64: 2, 1>, scalar_prefetch = 0 : i64, scratch_operands = 2 : i64, tpu.core_type = #tpu.core_type<tc>, window_params = [{transform_indices = @transform_0, window_bounds = array<i64: 1, 16, 256>}, {pipeline_mode = #tpu.pipeline_mode<synchronous>, transform_indices = @transform_1, window_bounds = array<i64: 8, 16>}, {transform_indices = @transform_2, window_bounds = array<i64: 1, 8, 1>}, {transform_indices = @transform_3, window_bounds = array<i64: 1, 8, 1>}]} {
    %c0_i32 = arith.constant 0 : i32
    %0 = arith.cmpi eq, %arg1, %c0_i32 : i32
    %1 = arith.extui %0 : i1 to i32
    %c0_i32_0 = arith.constant 0 : i32
    %2 = arith.cmpi ne, %1, %c0_i32_0 : i32
    scf.if %2 {
      %cst_17 = arith.constant 0.000000e+00 : f32
      %21 = vector.broadcast %cst_17 : f32 to vector<8x1xf32>
      %c0_18 = arith.constant 0 : index
      %c0_19 = arith.constant 0 : index
      %22 = vector.load %arg6[%c0_18, %c0_19] : memref<8x1xf32, #tpu.memory_space<vmem>>, vector<8x1xf32>
      tpu.vector_store %arg6[%c0_18, %c0_19], %21 {strides = array<i32>} : memref<8x1xf32, #tpu.memory_space<vmem>>, vector<8x1xf32>,
      %cst_20 = arith.constant 0.000000e+00 : f32
      %23 = vector.broadcast %cst_20 : f32 to vector<8x1xf32>
      %c0_21 = arith.constant 0 : index
      %c0_22 = arith.constant 0 : index
      %24 = vector.load %arg7[%c0_21, %c0_22] : memref<8x1xf32, #tpu.memory_space<vmem>>, vector<8x1xf32>
      tpu.vector_store %arg7[%c0_21, %c0_22], %23 {strides = array<i32>} : memref<8x1xf32, #tpu.memory_space<vmem>>, vector<8x1xf32>,
    } else {
    }
    %c0 = arith.constant 0 : index
    %c0_1 = arith.constant 0 : index
    %3 = vector.load %arg3[%c0, %c0_1] : memref<8x16xf32, #tpu.memory_space<vmem>>, vector<8x16xf32>
    %c0_2 = arith.constant 0 : index
    %c0_3 = arith.constant 0 : index
    %c0_4 = arith.constant 0 : index
    %4 = vector.load %arg2[%c0_2, %c0_3, %c0_4] : memref<1x16x256xf32, #tpu.memory_space<vmem>>, vector<1x16x256xf32>
    %5 = vector.shape_cast %4 : vector<1x16x256xf32> to vector<16x256xf32>
    %cst = arith.constant dense<0.000000e+00> : vector<8x256xf32>
    %6 = tpu.matmul %3, %5, %cst {dimension_numbers = #tpu.dot_dimension_numbers<[1], [0], [0], [1], [0, 0, 1, 1], [], []>} : vector<8x16xf32>, vector<16x256xf32>, vector<8x256xf32> -> vector<8x256xf32>
    %c0_5 = arith.constant 0 : index
    %c0_6 = arith.constant 0 : index
    %7 = vector.load %arg6[%c0_5, %c0_6] : memref<8x1xf32, #tpu.memory_space<vmem>>, vector<8x1xf32>
    %cst_7 = arith.constant dense<0.000000e+00> : vector<8xf32>
    %8 = vector.multi_reduction <add>, %6, %cst_7 [1] : vector<8x256xf32> to vector<8xf32>
    %9 = vector.shape_cast %8 : vector<8xf32> to vector<8x1xf32>
    %10 = arith.addf %7, %9 : vector<8x1xf32>
    %c0_8 = arith.constant 0 : index
    %c0_9 = arith.constant 0 : index
    %11 = vector.load %arg6[%c0_8, %c0_9] : memref<8x1xf32, #tpu.memory_space<vmem>>, vector<8x1xf32>
    tpu.vector_store %arg6[%c0_8, %c0_9], %10 {strides = array<i32>} : memref<8x1xf32, #tpu.memory_space<vmem>>, vector<8x1xf32>,
    %c0_10 = arith.constant 0 : index
    %c0_11 = arith.constant 0 : index
    %12 = vector.load %arg7[%c0_10, %c0_11] : memref<8x1xf32, #tpu.memory_space<vmem>>, vector<8x1xf32>
    %13 = arith.mulf %6, %6 : vector<8x256xf32>
    %cst_12 = arith.constant dense<0.000000e+00> : vector<8xf32>
    %14 = vector.multi_reduction <add>, %13, %cst_12 [1] : vector<8x256xf32> to vector<8xf32>
    %15 = vector.shape_cast %14 : vector<8xf32> to vector<8x1xf32>
    %16 = arith.addf %12, %15 : vector<8x1xf32>
    %c0_13 = arith.constant 0 : index
    %c0_14 = arith.constant 0 : index
    %17 = vector.load %arg7[%c0_13, %c0_14] : memref<8x1xf32, #tpu.memory_space<vmem>>, vector<8x1xf32>
    tpu.vector_store %arg7[%c0_13, %c0_14], %16 {strides = array<i32>} : memref<8x1xf32, #tpu.memory_space<vmem>>, vector<8x1xf32>,
    %c0_i32_15 = arith.constant 0 : i32
    %18 = arith.cmpi eq, %arg1, %c0_i32_15 : i32
    %19 = arith.extui %18 : i1 to i32
    %c0_i32_16 = arith.constant 0 : i32
    %20 = arith.cmpi ne, %19, %c0_i32_16 : i32
    scf.if %20 {
      %c0_17 = arith.constant 0 : index
      %c0_18 = arith.constant 0 : index
      %21 = vector.load %arg6[%c0_17, %c0_18] : memref<8x1xf32, #tpu.memory_space<vmem>>, vector<8x1xf32>
      %c0_19 = arith.constant 0 : index
      %c0_20 = arith.constant 0 : index
      %c0_21 = arith.constant 0 : index
      %22 = vector.load %arg4[%c0_19, %c0_20, %c0_21] : memref<1x8x1xf32, #tpu.memory_space<vmem>>, vector<1x8x1xf32>
      %23 = vector.shape_cast %22 : vector<1x8x1xf32> to vector<8x1xf32>
      %24 = vector.shape_cast %21 : vector<8x1xf32> to vector<1x8x1xf32>
      tpu.vector_store %arg4[%c0_19, %c0_20, %c0_21], %24 {strides = array<i32>} : memref<1x8x1xf32, #tpu.memory_space<vmem>>, vector<1x8x1xf32>,
      %c0_22 = arith.constant 0 : index
      %c0_23 = arith.constant 0 : index
      %25 = vector.load %arg7[%c0_22, %c0_23] : memref<8x1xf32, #tpu.memory_space<vmem>>, vector<8x1xf32>
      %c0_24 = arith.constant 0 : index
      %c0_25 = arith.constant 0 : index
      %c0_26 = arith.constant 0 : index
      %26 = vector.load %arg5[%c0_24, %c0_25, %c0_26] : memref<1x8x1xf32, #tpu.memory_space<vmem>>, vector<1x8x1xf32>
      %27 = vector.shape_cast %26 : vector<1x8x1xf32> to vector<8x1xf32>
      %28 = vector.shape_cast %25 : vector<8x1xf32> to vector<1x8x1xf32>
      tpu.vector_store %arg5[%c0_24, %c0_25, %c0_26], %28 {strides = array<i32>} : memref<1x8x1xf32, #tpu.memory_space<vmem>>, vector<1x8x1xf32>,
    } else {
    }
    return
  }
  func.func @transform_0(%arg0: i32, %arg1: i32) -> (i32, i32, i32) {
    %c0_i32 = arith.constant 0 : i32
    %c0_i32_0 = arith.constant 0 : i32
    return %arg0, %c0_i32, %arg1 : i32, i32, i32
  }
  func.func @transform_1(%arg0: i32, %arg1: i32) -> (i32, i32) {
    %c0_i32 = arith.constant 0 : i32
    %c0_i32_0 = arith.constant 0 : i32
    %c0_i32_1 = arith.constant 0 : i32
    return %c0_i32, %c0_i32_0 : i32, i32
  }
  func.func @transform_2(%arg0: i32, %arg1: i32) -> (i32, i32, i32) {
    %c0_i32 = arith.constant 0 : i32
    %c0_i32_0 = arith.constant 0 : i32
    %c0_i32_1 = arith.constant 0 : i32
    return %arg0, %c0_i32, %c0_i32_0 : i32, i32, i32
  }
  func.func @transform_3(%arg0: i32, %arg1: i32) -> (i32, i32, i32) {
    %c0_i32 = arith.constant 0 : i32
    %c0_i32_0 = arith.constant 0 : i32
    %c0_i32_1 = arith.constant 0 : i32
    return %arg0, %c0_i32, %c0_i32_0 : i32, i32, i32
  }
}

</mosaic_0001>

<bundles_post_ra>
// kernel: tpu_custom_call.1
= control target key start
LH: loop header
LB: loop body
LE: loop exit
PB: predicated region body
PF: predicated region fallthrough
CT: control target
= control target key end

     0   :  { %9 = vsyncpa [#allocation5], 0  ;;  %s864_s0 = inlined_call_operand.hbm [shape: f32[2,16,256], index: 0, kind: input, shape index: {}]   ;;  %s865_s1 = inlined_call_operand.hbm [shape: f32[8,16], index: 1, kind: input, shape index: {}]   ;;  %s866_s2 = inlined_call_operand.vmem [shape: f32[2,8,1], index: 2, kind: output, shape index: {0}]   ;;  %s867_s3 = inlined_call_operand.vmem [shape: f32[2,8,1], index: 3, kind: output, shape index: {1}]  }
   0x1   :  { %11 = vsyncpa [#allocation5 + $0x1], 0 }
   0x2   :  { %12 = vsyncpa [#allocation7], 0  ;;  %s685_s12 = smov 0   ;;  %s687_s13 = smov 0  }
   0x3   :  { %s689_s14 = smov 0   ;;  %s691_s15 = smov 0  }
   0x4   :  { %s693_s16 = smov 0   ;;  %s695_s17 = smov 0  }
   0x5 LB: > { %s456_s18 = sadd.s32 4294967295, %s658_s17   ;;  %s39_s19 = sadd.s32 1, %s646_s14  ;;  %s658_s17 = sphi %s695_s17, %s18_s17   ;;  %s654_s16 = sphi %s693_s16, %s887_s16   ;;  %s650_s15 = sphi %s691_s15, %s886_s15   ;;  %s646_s14 = sphi %s689_s14, %s885_s14   ;;  %s642_s13 = sphi %s687_s13, %s884_s13   ;;  %s638_s12 = sphi %s685_s12, %s883_s12  }
   0x6   : > { %p46_p0 = scmp.ne.s32.totalorder %s646_s14, %s642_s13  ;;  %p47_p1 = scmp.eq.s32.totalorder %s658_s17, 0 }
   0x7   : > { %p52_p2 = scmp.ne.s32.totalorder %s642_s13, %s638_s12  ;;  %p719_p3 = scmp.eq.s32.totalorder %s456_s18, 0 }
   0x8   : > { %p48_p4 = por %p47_p1, %p46_p0  ;;  %p458_p5 = scmp.ge.s32.totalorder %s658_s17, 1 }
   0x9   : > { %s873_s20 = scalar_select %p719_p3, 1, 0 }
   0xa   : > { %p726_p6 = por %p719_p3, %p52_p2  ;;  %p136_p7 = scmp.lt.s32.totalorder %s658_s17, 3 }
   0xb   : > { %s660_s23 = smov [#allocation6]   ;;  %p492_p10 = scmp.lt.s32.totalorder %s658_s17, 2 }
   0xc   : > { %s874_s21 = scalar_select %p726_p6, 1, 0 }
   0xd   : > { %p731_p8 = pnand %p458_p5, %p136_p7  ;;  %s149_s24 = sshll.u32 %s660_s23, 4  ;;  %s150_s24 = int_to_ptr.vmem [resolvable:$true] %s149_s24 }
   0xe   : > { %s160_s25 = sand.u32 1, %s646_s14   ;;  %p745_p12 = pnand %p492_p10, %p48_p4 }
   0xf   : > { %s875_s22 = scalar_select %p731_p8, 1, 0 }
  0x10   : > { %p483_p9 = pneg %p731_p8  ;;  %s546_s30 = scalar_lea.hbm %s865_s1, 128 }
  0x11   : > { %s877_s27 = scalar_select %p745_p12, 1, 0 }
  0x12   : > { %p741_p11 = pnand %p483_p9, %p719_p3  ;;  %p547_p13 = scmp.ne.s32.totalorder %s865_s1, %s546_s30 }
  0x13   : > { %p553_p5 = scmp.lt.u32.totalorder %s546_s30, %s865_s1 }
  0x14   : > { %p548_p0 = pneg %p741_p11 }
  0x16   : > { %p549_p1 = pnand %p548_p0, %p547_p13 }
  0x18   : > { %p550_p2 = pneg %p549_p1 }
  0x1a   : > { %p555_p4 = pnand %p553_p5, %p550_p2 }
  0x1c   : > { %558 = shalt.err (!%p555_p4)
}
  0x1d   : > { %s559_s8 = scalar_lea.vmem %s150_s24, 128  ;;  %p567_p3 = scmp.lt.s32.totalorder %s150_s24, %s150_s24 }
  0x1e   : > { %p560_p7 = scmp.ne.s32.totalorder %s150_s24, %s559_s8  ;;  %p568_p6 = scmp.lt.s32.totalorder %s559_s8, %s559_s8 }
  0x20   : > { %p562_p9 = pnand %p560_p7, %p548_p0  ;;  %p569_p8 = por %p568_p6, %p567_p3 }
  0x22   : > { %p563_p10 = pneg %p562_p9 }
  0x24   : > { %p570_p12 = pnand %p569_p8, %p563_p10 }
  0x26   : > { %573 = shalt.err (!%p570_p12)
}
  0x27   : > { %486 = dma.hbm_to_vmem [thread:$0]  (!%p741_p11), %s865_s1, 128, %s150_s24, [#allocation7]  }
  0x28   : > { %s30_s11 = sadd.s32 1, %s654_s16  ;;  %s461_s12 = sshll.u32 %s160_s25, 5 }
  0x29   : > { %p32_p13 = scmp.ge.s32.totalorder %s30_s11, 2  ;;  %s472_s18 = sshll.u32 %s654_s16, 9 }
  0x2a   : > { %s164_s23 = scalar_lea.vmem [#allocation4], %s461_s12  ;;  %s774_s30 = scalar_lea.hbm %s864_s0, %s472_s18 }
  0x2b   : > { %s173_s28 = sshll.u32 %s164_s23, 4  ;;  %s889_s11 = smov (%p32_p13, %s30_s11), 0  ;;  %s776_s28 = int_to_ptr.vmem [resolvable:$true] %s173_s28 }
  0x2c   : > { %s34_s24 = ssub.s32 %s654_s16, %s889_s11  ;;  %s786_s5 = scalar_lea.sflag [#allocation5], %s160_s25 }
  0x2d   : > { %p780_p3 = scmp.eq.s32.totalorder %s34_s24, 0  ;;  %s574_s6 = scalar_lea.hbm %s774_s30, 512 }
  0x2e   : > { %p575_p6 = scmp.ne.s32.totalorder %s774_s30, %s574_s6  ;;  %p879_p8 = scmp.ne.s32.totalorder %s877_s27, 0 }
  0x2f   : > { %s579_s9 = scalar_lea.hbm %s864_s0, 1024  ;;  %p580_p1 = scmp.lt.u32.totalorder %s774_s30, %s864_s0 }
  0x30   : > { %p576_p11 = pneg %p879_p8  ;;  %p581_p2 = scmp.lt.u32.totalorder %s579_s9, %s574_s6 }
  0x31   : > { %p583_p4 = scmp.lt.u32.totalorder %s574_s6, %s774_s30 }
  0x32   : > { %p577_p12 = pnand %p576_p11, %p575_p6  ;;  %p582_p5 = por %p581_p2, %p580_p1 }
  0x34   : > { %p578_p0 = pneg %p577_p12  ;;  %p584_p7 = por %p583_p4, %p582_p5 }
  0x36   : > { %p585_p9 = pnand %p584_p7, %p578_p0 }
  0x38   : > { %588 = shalt.err (!%p585_p9)
}
  0x39   : > { %s589_s25 = scalar_lea.vmem %s776_s28, 512  ;;  %s661_s18 = smov [#allocation4]  }
  0x3a   : > { %p590_p10 = scmp.ne.s32.totalorder %s776_s28, %s589_s25  ;;  %s594_s23 = sshll.u32 %s661_s18, 4  ;;  %s595_s23 = int_to_ptr.vmem [resolvable:$false] %s594_s23 }
  0x3b   : > { %s596_s26 = scalar_lea.vmem %s595_s23, 1024  ;;  %p597_p12 = scmp.lt.s32.totalorder %s776_s28, %s595_s23 }
  0x3c   : > { %p592_p13 = pnand %p590_p10, %p576_p11  ;;  %p598_p1 = scmp.lt.s32.totalorder %s596_s26, %s589_s25 }
  0x3e   : > { %p593_p6 = pneg %p592_p13  ;;  %p599_p2 = por %p598_p1, %p597_p12 }
  0x40   : > { %p600_p5 = pnand %p599_p2, %p593_p6 }
  0x42   : > { %603 = shalt.err (!%p600_p5)
}
  0x43   : > { %s662_s29 = smov 256   ;;  %s663_s24 = smov 16  }
  0x44   : > { %490 = dma.hbm_to_vmem [thread:$0]  (!%p879_p8), %s774_s30, 512, %s776_s28, %s786_s5, %s662_s29, %s662_s29, %s663_s24  }
  0x45   : > { %s819_s6 = scalar_select %p780_p3, %s646_s14, %s39_s19  }
  0x46   : > { %p880_p11 = scmp.ne.s32.totalorder %s875_s22, 0 }
  0x47   : > { %s187_s7 = sand.u32 (!%p880_p11), 1, %s642_s13   ;;  %p881_p0 = scmp.ne.s32.totalorder (!%p880_p11), %s874_s21, 0 }
  0x48   : > { %185 = sbr.rel (%p880_p11) target bundleno = 462 (0x1ce), region = 28  ;;  %s465_s8 = sshll.u32 (!%p880_p11), %s187_s7, 5 }
  0x49   : > { %s188_s9 = scalar_lea.sflag (!%p880_p11), [#allocation5], %s187_s7  ;;  %s191_s10 = scalar_lea.vmem (!%p880_p11), [#allocation4], %s465_s8 }
  0x4f   : > { %629 = dma.done.wait (%p881_p0), %s188_s9, 512  }
  0x50   : > { %631 = vsyncadd (%p881_p0), %s188_s9, 4294966784  ;;  %p882_p8 = scmp.ne.s32.totalorder %s873_s20, 0 }
  0x52   : > { %633 = dma.done.wait (%p882_p8), [#allocation7], 128  }
  0x53   : > { %635 = vsyncadd (%p882_p8), [#allocation7], 4294967168  ;;  %vm234_vm0 = vcmask 7168   ;;  %v664_v0 = vmov 0.0   ;;  %v239_v1 = vld [vmem:[%s191_s10 + $0x8] sm:$0xff]  ;;  %v241_v2 = vld [vmem:[%s191_s10 + $0x18] sm:$0xff] }
  0x54   : > { %235 = vst.msk [vmem:[#allocation2] sm:$0xff] %vm234_vm0, %v664_v0  ;;  %236 = vst.msk [vmem:[#allocation3] sm:$0xff] %vm234_vm0, %v664_v0  ;;  %310 = vmatprep.mubr.f32.mxu0 %v664_v0  ;;  %v238_v3 = vld [vmem:[%s191_s10] sm:$0xff]  ;;  %v473_v4 = vpack.c.bf16 %v241_v2, %v239_v1  ;;  %v240_v5 = vld [vmem:[%s191_s10 + $0x10] sm:$0xff]  ;;  %vm242_vm1 = vcmask 130048   ;;  %p222_p3 = scmp.lt.s32.totalorder %s650_s15, 1 }
  0x55   : > { %v475_v6 = vpack.c.bf16 %v240_v5, %v238_v3  ;;  %v237_v7 = vld [vmem:[#allocation6] sm:$0xff] }
  0x56   : > { %474 = vmatprep.subr.bf16.mxu0 %v473_v4  ;;  %s891_s15 = smov (!%p222_p3, %s650_s15), 1 }
  0x57   : > { %476 = vmatpush1.bf16.msra.mxu0 %v475_v6  ;;  %s467_s19 = sshll.u32 %s891_s15, 3 }
  0x58   : > { %s225_s22 = scalar_lea.vmem %s866_s2, %s467_s19  ;;  %s229_s30 = scalar_lea.vmem %s867_s3, %s467_s19 }
  0x5a   : > { %469 = vmatmul.mubr.msk.f32.vlgmr.msra.gmra.mrb[0].mxu0 %vm242_vm1, %v237_v7 }
  0x5b   : > { %v317_v14 = vld [vmem:[#allocation2] sm:$0xff]  ;;  %v324_v17 = vld [vmem:[#allocation3] sm:$0xff] }
 0x12d   : > { %v312_v8 = vpop.f32.mrb[0].mxu0 }
 0x12e   : > { %v325_v9 = vmul.f32 %v312_v8, %v312_v8  ;;  %v314_v10 = vpop.f32.mrb[1].mxu0 }
 0x12f   : > { %v326_v11 = vmul.f32 %v314_v10, %v314_v10  ;;  %v318_v12 = vadd.f32 %v314_v10, %v312_v8 }
 0x131   : > { %319 = vadd.xlane.f32.xlu0 %v318_v12  ;;  %v327_v13 = vadd.f32 %v326_v11, %v325_v9 }
 0x135   : > { %328 = vadd.xlane.f32.xlu0 %v327_v13 }
 0x1be   : > { %v320_v15 = vpop.xlane.xlu0 %319 }
 0x1bf   : > { %v321_v16 = vadd.f32 %v320_v15, %v317_v14 }
 0x1c1   : > { %323 = vst.msk [vmem:[#allocation2] sm:$0xff] %vm234_vm0, %v321_v16 }
 0x1c2   : > { %v329_v18 = vpop.xlane.xlu0 %328 }
 0x1c3   : > { %v330_v19 = vadd.f32 %v329_v18, %v324_v17 }
 0x1c5   : > { %331 = vst.msk [vmem:[#allocation3] sm:$0xff] %vm234_vm0, %v330_v19 }
 0x1c8   : > { %v335_v20 = vld [vmem:[#allocation2] sm:$0xff] }
 0x1c9   : > { %336 = vst.msk [vmem:[%s225_s22] sm:$0xff] %vm234_vm0, %v335_v20 }
 0x1cc   : > { %v337_v21 = vld [vmem:[#allocation3] sm:$0xff] }
 0x1cd   : > { %338 = vst.msk [vmem:[%s229_s30] sm:$0xff] %vm234_vm0, %v337_v21 }
 0x1ce PF: > { %s18_s17 = sadd.s32 1, %s658_s17   ;;  %s883_s12 = smov %s642_s13 }
 0x1cf   : > { %p15_p4 = scmp.ge.s32.totalorder %s18_s17, 4   ;;  %s884_s13 = smov %s646_s14 }
 0x1d0   : > { %s885_s14 = smov %s819_s6  ;;  %s886_s15 = smov %s654_s16 }
 0x1d1   : > { %s887_s16 = smov %s889_s11  ;;  %17 = sbr.rel (!%p15_p4) target bundleno = 5 (0x5), region = 92 }
 0x1d8   :  { %372 = vsyncpa [#allocation5], 1 }
 0x1d9   :  { %374 = vsyncpa [#allocation5 + $0x1], 1 }
 0x1da   :  { %375 = vsyncpa [#allocation7], 1 }

</bundles_post_ra>
